<compile_context>
chip_gen: v5e
topology: v5e:2x2
jax: 0.10.0
libtpu: 0.0.40
codegen_flags: <defaults>
</compile_context>

<pallas_src>
import jax
import jax.numpy as jnp
from jax.experimental import pallas as pl
from jax.experimental.pallas import tpu as pltpu

BN_EPS = 1e-5
LEAKY_SLOPE = 0.01  # nn.LeakyReLU() default negative_slope


def _leaky_relu(x):
    return jnp.where(x > 0, x, LEAKY_SLOPE * x)


def embedding_kernel(x_ref, w1_ref, b1_ref, w2_ref, b2_ref, w3_ref, b3_ref, o_ref):
    # x.view(-1, input_dim) is done in the wrapper; the +1e-8 is fused here.
    h = x_ref[...].astype(jnp.float32) + 1e-8
    # Linear1 (+ folded BatchNorm1) -> LeakyReLU
    h = jnp.dot(h, w1_ref[...], preferred_element_type=jnp.float32) + b1_ref[...]
    h = _leaky_relu(h)
    # Linear2 (+ folded BatchNorm2) -> LeakyReLU
    h = jnp.dot(h, w2_ref[...], preferred_element_type=jnp.float32) + b2_ref[...]
    h = _leaky_relu(h)
    # Linear3 -> LeakyReLU
    h = jnp.dot(h, w3_ref[...], preferred_element_type=jnp.float32) + b3_ref[...]
    h = _leaky_relu(h)
    o_ref[...] = h.astype(o_ref.dtype)


def _round_up(a, b):
    return (a + b - 1) // b * b


def _fold_bn_into_linear(w, b, gamma, beta, mean, var, eps=BN_EPS):
    """Fold eval-mode BatchNorm1d into the preceding torch-layout Linear (out, in)."""
    s = gamma / jnp.sqrt(var + eps)
    w_eff = w * s[:, None]
    b_eff = b * s + (beta - mean * s)
    return w_eff, b_eff


def embedding_forward(x, params, *, tile_n=256):
    """x: any shape reshapeable to (-1, input_dim). Returns (N, dim_embed) float32."""
    (w1, b1, g1, be1, m1, v1,
     w2, b2, g2, be2, m2, v2,
     w3, b3) = params
    d_emb, d_in = w1.shape

    x2 = x.reshape(-1, d_in).astype(jnp.float32)
    n = x2.shape[0]

    # Fold eval-mode BatchNorm (running stats) into the Linear weights/biases.
    # TODO(synk): training-mode BatchNorm1d (batch statistics) would need a
    # cross-tile reduction over the whole batch; only inference-mode is fused here.
    w1e, b1e = _fold_bn_into_linear(w1, b1, g1, be1, m1, v1)
    w2e, b2e = _fold_bn_into_linear(w2, b2, g2, be2, m2, v2)

    w1t = w1e.T                       # (d_in, d_emb)
    w2t = w2e.T                       # (d_emb, d_emb)
    w3t = w3.T                        # (d_emb, d_emb)
    b1r = b1e.reshape(1, d_emb)
    b2r = b2e.reshape(1, d_emb)
    b3r = b3.reshape(1, d_emb)

    # Batch tiling: pad N up to a multiple of the tile; padded rows are sliced off.
    tile = max(8, min(_round_up(tile_n, 8), _round_up(n, 8)))
    n_pad = _round_up(n, tile)
    if n_pad != n:
        x2 = jnp.pad(x2, ((0, n_pad - n), (0, 0)))
    grid = (n_pad // tile,)

    flops = 2 * n_pad * (d_in * d_emb + 2 * d_emb * d_emb)
    bytes_accessed = 4 * (n_pad * d_in + n_pad * d_emb
                          + d_in * d_emb + 2 * d_emb * d_emb + 3 * d_emb)

    out = pl.pallas_call(
        embedding_kernel,
        out_shape=jax.ShapeDtypeStruct((n_pad, d_emb), jnp.float32),
        grid=grid,
        in_specs=[
            pl.BlockSpec((tile, d_in), lambda i: (i, 0)),    # x: streamed per tile
            pl.BlockSpec((d_in, d_emb), lambda i: (0, 0)),   # weights/biases resident
            pl.BlockSpec((1, d_emb), lambda i: (0, 0)),
            pl.BlockSpec((d_emb, d_emb), lambda i: (0, 0)),
            pl.BlockSpec((1, d_emb), lambda i: (0, 0)),
            pl.BlockSpec((d_emb, d_emb), lambda i: (0, 0)),
            pl.BlockSpec((1, d_emb), lambda i: (0, 0)),
        ],
        out_specs=pl.BlockSpec((tile, d_emb), lambda i: (i, 0)),
        compiler_params=pltpu.CompilerParams(
            dimension_semantics=("parallel",)),
        cost_estimate=pl.CostEstimate(
            flops=flops, transcendentals=0, bytes_accessed=bytes_accessed),
    )(x2, w1t, b1r, w2t, b2r, w3t, b3r)
    return out[:n]


def init_params(key, input_dim, dim_embed):
    k = jax.random.split(key, 14)
    w1 = jax.random.normal(k[0], (dim_embed, input_dim), jnp.float32) * 0.1
    b1 = jax.random.normal(k[1], (dim_embed,), jnp.float32) * 0.01
    g1 = jax.random.uniform(k[2], (dim_embed,), jnp.float32, 0.8, 1.2)
    be1 = jax.random.normal(k[3], (dim_embed,), jnp.float32) * 0.01
    m1 = jax.random.normal(k[4], (dim_embed,), jnp.float32) * 0.05
    v1 = jax.random.uniform(k[5], (dim_embed,), jnp.float32, 0.5, 1.5)
    w2 = jax.random.normal(k[6], (dim_embed, dim_embed), jnp.float32) * 0.1
    b2 = jax.random.normal(k[7], (dim_embed,), jnp.float32) * 0.01
    g2 = jax.random.uniform(k[8], (dim_embed,), jnp.float32, 0.8, 1.2)
    be2 = jax.random.normal(k[9], (dim_embed,), jnp.float32) * 0.01
    m2 = jax.random.normal(k[10], (dim_embed,), jnp.float32) * 0.05
    v2 = jax.random.uniform(k[11], (dim_embed,), jnp.float32, 0.5, 1.5)
    w3 = jax.random.normal(k[12], (dim_embed, dim_embed), jnp.float32) * 0.1
    b3 = jax.random.normal(k[13], (dim_embed,), jnp.float32) * 0.01
    return (w1, b1, g1, be1, m1, v1, w2, b2, g2, be2, m2, v2, w3, b3)


def embedding_reference(x, params):
    """Plain-JAX reference (eval-mode BatchNorm) for verification."""
    (w1, b1, g1, be1, m1, v1,
     w2, b2, g2, be2, m2, v2,
     w3, b3) = params
    d_in = w1.shape[1]
    h = x.reshape(-1, d_in) + 1e-8
    h = h @ w1.T + b1
    h = g1 * (h - m1) / jnp.sqrt(v1 + BN_EPS) + be1
    h = jnp.where(h > 0, h, LEAKY_SLOPE * h)
    h = h @ w2.T + b2
    h = g2 * (h - m2) / jnp.sqrt(v2 + BN_EPS) + be2
    h = jnp.where(h > 0, h, LEAKY_SLOPE * h)
    h = h @ w3.T + b3
    h = jnp.where(h > 0, h, LEAKY_SLOPE * h)
    return h


if __name__ == "__main__":
    INPUT_DIM = 32
    DIM_EMBED = 32
    BATCH = 16

    key = jax.random.PRNGKey(0)
    kx, kp = jax.random.split(key)
    x = jax.random.normal(kx, (BATCH, INPUT_DIM), jnp.float32)
    params = init_params(kp, INPUT_DIM, DIM_EMBED)

    # tile_n=8 exercises a multi-step batch grid even at this small batch size.
    out = embedding_forward(x, params, tile_n=8)
    out = jax.block_until_ready(out)

    ref = embedding_reference(x, params)
    assert out.shape == (BATCH, DIM_EMBED)
    assert jnp.allclose(out, ref, atol=1e-4, rtol=1e-4)
    print("KERNEL_OK")
</pallas_src>

<mosaic_0001>
module attributes {stable_mosaic.version = 11 : i64} {
  func.func @embedding_kernel(%arg0: i32, %arg1: memref<8x32xf32, #tpu.memory_space<vmem>>, %arg2: memref<32x32xf32, #tpu.memory_space<vmem>>, %arg3: memref<1x32xf32, #tpu.memory_space<vmem>>, %arg4: memref<32x32xf32, #tpu.memory_space<vmem>>, %arg5: memref<1x32xf32, #tpu.memory_space<vmem>>, %arg6: memref<32x32xf32, #tpu.memory_space<vmem>>, %arg7: memref<1x32xf32, #tpu.memory_space<vmem>>, %arg8: memref<8x32xf32, #tpu.memory_space<vmem>>) attributes {dimension_semantics = [#tpu.dimension_semantics<parallel>], iteration_bounds = array<i64: 2>, scalar_prefetch = 0 : i64, scratch_operands = 0 : i64, tpu.core_type = #tpu.core_type<tc>, window_params = [{transform_indices = @transform_0, window_bounds = array<i64: 8, 32>}, {pipeline_mode = #tpu.pipeline_mode<synchronous>, transform_indices = @transform_1, window_bounds = array<i64: 32, 32>}, {pipeline_mode = #tpu.pipeline_mode<synchronous>, transform_indices = @transform_2, window_bounds = array<i64: 1, 32>}, {pipeline_mode = #tpu.pipeline_mode<synchronous>, transform_indices = @transform_3, window_bounds = array<i64: 32, 32>}, {pipeline_mode = #tpu.pipeline_mode<synchronous>, transform_indices = @transform_4, window_bounds = array<i64: 1, 32>}, {pipeline_mode = #tpu.pipeline_mode<synchronous>, transform_indices = @transform_5, window_bounds = array<i64: 32, 32>}, {pipeline_mode = #tpu.pipeline_mode<synchronous>, transform_indices = @transform_6, window_bounds = array<i64: 1, 32>}, {transform_indices = @transform_7, window_bounds = array<i64: 8, 32>}]} {
    %c0 = arith.constant 0 : index
    %c0_0 = arith.constant 0 : index
    %0 = vector.load %arg1[%c0, %c0_0] : memref<8x32xf32, #tpu.memory_space<vmem>>, vector<8x32xf32>
    %cst = arith.constant 9.99999993E-9 : f32
    %1 = vector.broadcast %cst : f32 to vector<8x32xf32>
    %2 = arith.addf %0, %1 : vector<8x32xf32>
    %c0_1 = arith.constant 0 : index
    %c0_2 = arith.constant 0 : index
    %3 = vector.load %arg2[%c0_1, %c0_2] : memref<32x32xf32, #tpu.memory_space<vmem>>, vector<32x32xf32>
    %cst_3 = arith.constant dense<0.000000e+00> : vector<8x32xf32>
    %4 = tpu.matmul %2, %3, %cst_3 {dimension_numbers = #tpu.dot_dimension_numbers<[1], [0], [0], [1], [0, 0, 1, 1], [], []>} : vector<8x32xf32>, vector<32x32xf32>, vector<8x32xf32> -> vector<8x32xf32>
    %c0_4 = arith.constant 0 : index
    %c0_5 = arith.constant 0 : index
    %5 = vector.load %arg3[%c0_4, %c0_5] : memref<1x32xf32, #tpu.memory_space<vmem>>, vector<1x32xf32>
    %6 = vector.broadcast %5 : vector<1x32xf32> to vector<8x32xf32>
    %7 = arith.addf %4, %6 : vector<8x32xf32>
    %cst_6 = arith.constant 0.000000e+00 : f32
    %8 = vector.broadcast %cst_6 : f32 to vector<8x32xf32>
    %9 = arith.cmpf ogt, %7, %8 : vector<8x32xf32>
    %cst_7 = arith.constant 0.00999999977 : f32
    %10 = vector.broadcast %cst_7 : f32 to vector<8x32xf32>
    %11 = arith.mulf %10, %7 : vector<8x32xf32>
    %12 = arith.select %9, %7, %11 : vector<8x32xi1>, vector<8x32xf32>
    %c0_8 = arith.constant 0 : index
    %c0_9 = arith.constant 0 : index
    %13 = vector.load %arg4[%c0_8, %c0_9] : memref<32x32xf32, #tpu.memory_space<vmem>>, vector<32x32xf32>
    %cst_10 = arith.constant dense<0.000000e+00> : vector<8x32xf32>
    %14 = tpu.matmul %12, %13, %cst_10 {dimension_numbers = #tpu.dot_dimension_numbers<[1], [0], [0], [1], [0, 0, 1, 1], [], []>} : vector<8x32xf32>, vector<32x32xf32>, vector<8x32xf32> -> vector<8x32xf32>
    %c0_11 = arith.constant 0 : index
    %c0_12 = arith.constant 0 : index
    %15 = vector.load %arg5[%c0_11, %c0_12] : memref<1x32xf32, #tpu.memory_space<vmem>>, vector<1x32xf32>
    %16 = vector.broadcast %15 : vector<1x32xf32> to vector<8x32xf32>
    %17 = arith.addf %14, %16 : vector<8x32xf32>
    %cst_13 = arith.constant 0.000000e+00 : f32
    %18 = vector.broadcast %cst_13 : f32 to vector<8x32xf32>
    %19 = arith.cmpf ogt, %17, %18 : vector<8x32xf32>
    %cst_14 = arith.constant 0.00999999977 : f32
    %20 = vector.broadcast %cst_14 : f32 to vector<8x32xf32>
    %21 = arith.mulf %20, %17 : vector<8x32xf32>
    %22 = arith.select %19, %17, %21 : vector<8x32xi1>, vector<8x32xf32>
    %c0_15 = arith.constant 0 : index
    %c0_16 = arith.constant 0 : index
    %23 = vector.load %arg6[%c0_15, %c0_16] : memref<32x32xf32, #tpu.memory_space<vmem>>, vector<32x32xf32>
    %cst_17 = arith.constant dense<0.000000e+00> : vector<8x32xf32>
    %24 = tpu.matmul %22, %23, %cst_17 {dimension_numbers = #tpu.dot_dimension_numbers<[1], [0], [0], [1], [0, 0, 1, 1], [], []>} : vector<8x32xf32>, vector<32x32xf32>, vector<8x32xf32> -> vector<8x32xf32>
    %c0_18 = arith.constant 0 : index
    %c0_19 = arith.constant 0 : index
    %25 = vector.load %arg7[%c0_18, %c0_19] : memref<1x32xf32, #tpu.memory_space<vmem>>, vector<1x32xf32>
    %26 = vector.broadcast %25 : vector<1x32xf32> to vector<8x32xf32>
    %27 = arith.addf %24, %26 : vector<8x32xf32>
    %cst_20 = arith.constant 0.000000e+00 : f32
    %28 = vector.broadcast %cst_20 : f32 to vector<8x32xf32>
    %29 = arith.cmpf ogt, %27, %28 : vector<8x32xf32>
    %cst_21 = arith.constant 0.00999999977 : f32
    %30 = vector.broadcast %cst_21 : f32 to vector<8x32xf32>
    %31 = arith.mulf %30, %27 : vector<8x32xf32>
    %32 = arith.select %29, %27, %31 : vector<8x32xi1>, vector<8x32xf32>
    %c0_22 = arith.constant 0 : index
    %c0_23 = arith.constant 0 : index
    %33 = vector.load %arg8[%c0_22, %c0_23] : memref<8x32xf32, #tpu.memory_space<vmem>>, vector<8x32xf32>
    tpu.vector_store %arg8[%c0_22, %c0_23], %32 {strides = array<i32>} : memref<8x32xf32, #tpu.memory_space<vmem>>, vector<8x32xf32>,
    return
  }
  func.func @transform_0(%arg0: i32) -> (i32, i32) {
    %c0_i32 = arith.constant 0 : i32
    %c0_i32_0 = arith.constant 0 : i32
    return %arg0, %c0_i32 : i32, i32
  }
  func.func @transform_1(%arg0: i32) -> (i32, i32) {
    %c0_i32 = arith.constant 0 : i32
    %c0_i32_0 = arith.constant 0 : i32
    %c0_i32_1 = arith.constant 0 : i32
    return %c0_i32, %c0_i32_0 : i32, i32
  }
  func.func @transform_2(%arg0: i32) -> (i32, i32) {
    %c0_i32 = arith.constant 0 : i32
    %c0_i32_0 = arith.constant 0 : i32
    %c0_i32_1 = arith.constant 0 : i32
    return %c0_i32, %c0_i32_0 : i32, i32
  }
  func.func @transform_3(%arg0: i32) -> (i32, i32) {
    %c0_i32 = arith.constant 0 : i32
    %c0_i32_0 = arith.constant 0 : i32
    %c0_i32_1 = arith.constant 0 : i32
    return %c0_i32, %c0_i32_0 : i32, i32
  }
  func.func @transform_4(%arg0: i32) -> (i32, i32) {
    %c0_i32 = arith.constant 0 : i32
    %c0_i32_0 = arith.constant 0 : i32
    %c0_i32_1 = arith.constant 0 : i32
    return %c0_i32, %c0_i32_0 : i32, i32
  }
  func.func @transform_5(%arg0: i32) -> (i32, i32) {
    %c0_i32 = arith.constant 0 : i32
    %c0_i32_0 = arith.constant 0 : i32
    %c0_i32_1 = arith.constant 0 : i32
    return %c0_i32, %c0_i32_0 : i32, i32
  }
  func.func @transform_6(%arg0: i32) -> (i32, i32) {
    %c0_i32 = arith.constant 0 : i32
    %c0_i32_0 = arith.constant 0 : i32
    %c0_i32_1 = arith.constant 0 : i32
    return %c0_i32, %c0_i32_0 : i32, i32
  }
  func.func @transform_7(%arg0: i32) -> (i32, i32) {
    %c0_i32 = arith.constant 0 : i32
    %c0_i32_0 = arith.constant 0 : i32
    return %arg0, %c0_i32 : i32, i32
  }
}

</mosaic_0001>

<bundles_post_ra>
// kernel: tpu_custom_call.1
= control target key start
LH: loop header
LB: loop body
LE: loop exit
PB: predicated region body
PF: predicated region fallthrough
CT: control target
= control target key end

     0   :  { %s1084_s0 = inlined_call_operand.hbm [shape: f32[16,32], index: 0, kind: input, shape index: {}]   ;;  %s1085_s1 = inlined_call_operand.hbm [shape: f32[32,32], index: 1, kind: input, shape index: {}]   ;;  %s1086_s2 = inlined_call_operand.vmem [shape: f32[1,32], index: 2, kind: input, shape index: {}]   ;;  %s1087_s3 = inlined_call_operand.hbm [shape: f32[32,32], index: 3, kind: input, shape index: {}]   ;;  %s1088_s4 = inlined_call_operand.vmem [shape: f32[1,32], index: 4, kind: input, shape index: {}]   ;;  %s1089_s5 = inlined_call_operand.hbm [shape: f32[32,32], index: 5, kind: input, shape index: {}]   ;;  %s1090_s6 = inlined_call_operand.vmem [shape: f32[1,32], index: 6, kind: input, shape index: {}]   ;;  %s1091_s7 = inlined_call_operand.hbm [shape: f32[16,32], index: 7, kind: output, shape index: {}]  }
   0x1   :  { %1092 = sst [smem:[#allocation15_spill]] %s1085_s1 }
   0x2   :  { %12 = vsyncpa [#allocation3], 0 }
   0x3   :  { %14 = vsyncpa [#allocation3 + $0x1], 0 }
   0x4   :  { %15 = vsyncpa [#allocation6], 0 }
   0x5   :  { %16 = vsyncpa [#allocation9], 0 }
   0x6   :  { %17 = vsyncpa [#allocation4], 0 }
   0x7   :  { %19 = vsyncpa [#allocation4 + $0x1], 0  ;;  %s911_s24 = smov 0   ;;  %s913_s25 = smov 0  }
   0x8   :  { %s915_s26 = smov 0   ;;  %s917_s27 = smov 0  }
   0x9 LB: > { %s1093_s1 = sld [smem:[#allocation15_spill]]  ;;  %s935_s8 = sadd.s32 4294967295, %s864_s27   ;;  %s864_s27 = sphi %s917_s27, %s1104_s27   ;;  %s860_s26 = sphi %s915_s26, %s1103_s26   ;;  %s856_s25 = sphi %s913_s25, %s1102_s25   ;;  %s852_s24 = sphi %s911_s24, %s1101_s24  }
   0xa   : > { %p568_p0 = scmp.ge.s32.totalorder %s864_s27, 1  ;;  %p46_p1 = scmp.eq.s32.totalorder %s935_s8, 0 }
   0xb   : > { %p208_p2 = scmp.lt.s32.totalorder %s864_s27, 3  ;;  %s866_s10 = smov [#allocation5]  }
   0xc   : > { %s221_s11 = sshll.u32 %s866_s10, 4  ;;  %s236_s14 = sshll.u32 %s1087_s3, 4  ;;  %s222_s11 = int_to_ptr.vmem [resolvable:$true] %s221_s11  ;;  %s237_s14 = int_to_ptr.hbm [resolvable:$true] %s236_s14 }
   0xd   : > { %p940_p3 = pnand %p568_p0, %p208_p2  ;;  %s253_s18 = sshll.u32 %s1089_s5, 4  ;;  %s254_s18 = int_to_ptr.hbm [resolvable:$true] %s253_s18 }
   0xe   : > { %s867_s19 = smov [#allocation7]   ;;  %s868_s21 = smov 128  }
   0xf   : > { %s219_s30 = sshll.u32 %s1093_s1, 4  ;;  %p604_p4 = pneg %p940_p3  ;;  %s220_s30 = int_to_ptr.hbm [resolvable:$true] %s219_s30 }
  0x10   : > { %s238_s20 = sshll.u32 %s867_s19, 4  ;;  %s869_s22 = smov 8   ;;  %s239_s20 = int_to_ptr.vmem [resolvable:$true] %s238_s20 }
  0x11   : > { %p952_p6 = pnand %p604_p4, %p46_p1  ;;  %s870_s23 = smov [#allocation8]  }
  0x12   : > { %s255_s28 = sshll.u32 %s870_s23, 4  ;;  %s567_s29 = sadd.s32 4294967294, %s864_s27   ;;  %s256_s28 = int_to_ptr.vmem [resolvable:$true] %s255_s28 }
  0x13   : > { %607 = dma.hbm_to_vmem [thread:$0]  (!%p952_p6), %s220_s30, 512, %s222_s11, [#allocation6], %s868_s21, %s868_s21, %s869_s22  }
  0x14   : > { %610 = dma.hbm_to_vmem [thread:$0]  (!%p952_p6), %s237_s14, 512, %s239_s20, [#allocation6], %s868_s21, %s868_s21, %s869_s22  }
  0x15   : > { %613 = dma.hbm_to_vmem [thread:$0]  (!%p952_p6), %s254_s18, 512, %s256_s28, [#allocation9], %s868_s21, %s868_s21, %s869_s22  }
  0x16   : > { %s967_s10 = sadd.s32 1, %s864_s27   ;;  %s32_s12 = sadd.s32 1, %s860_s26 }
  0x17   : > { %s29_s30 = ssub.s32 %s864_s27, %s967_s10  ;;  %p39_p7 = scmp.ne.s32.totalorder %s860_s26, %s856_s25 }
  0x18   : > { %p30_p8 = scmp.eq.s32.totalorder %s29_s30, 0  ;;  %p40_p9 = scmp.eq.s32.totalorder %s864_s27, 0 }
  0x19   : > { %p45_p10 = scmp.ne.s32.totalorder %s856_s25, %s852_s24  ;;  %p195_p11 = scmp.eq.s32.totalorder %s935_s8, 1 }
  0x1a   : > { %s979_s11 = scalar_select %p30_p8, %s860_s26, %s32_s12  }
  0x1b   : > { %p983_p12 = por %p46_p1, %p45_p10  ;;  %p987_p13 = por %p195_p11, %p39_p7 }
  0x1c   : > { %p201_p0 = scmp.eq.s32.totalorder %s567_s29, 1  ;;  %p41_p2 = por %p40_p9, %p39_p7 }
  0x1d   : > { %s272_s15 = sand.u32 1, %s860_s26   ;;  %p625_p6 = scmp.lt.s32.totalorder %s864_s27, 2 }
  0x1e   : > { %p992_p4 = por %p201_p0, %p45_p10  ;;  %s573_s17 = sshll.u32 %s272_s15, 3 }
  0x1f   : > { %s574_s18 = sshll.u32 %s864_s27, 3  ;;  %s276_s23 = scalar_lea.vmem [#allocation2], %s573_s17 }
  0x20   : > { %s280_s21 = scalar_lea.hbm %s1084_s0, %s574_s18  ;;  %s284_s28 = sshll.u32 %s276_s23, 4  ;;  %s285_s28 = int_to_ptr.vmem [resolvable:$true] %s284_s28 }
  0x21   : > { %s282_s22 = sshll.u32 %s280_s21, 4  ;;  %p1001_p8 = pnand %p625_p6, %p41_p2  ;;  %s283_s22 = int_to_ptr.hbm [resolvable:$true] %s282_s22 }
  0x22   : > { %s273_s12 = scalar_lea.sflag [#allocation3], %s272_s15  ;;  %s760_s30 = sshra.s32 %s283_s22, 4  ;;  %s761_s30 = int_to_ptr.hbm [resolvable:$true] %s760_s30 }
  0x23   : > { %s762_s1 = scalar_lea.hbm %s761_s30, 8  ;;  %p764_p9 = pneg %p1001_p8 }
  0x24   : > { %p763_p7 = scmp.ne.s32.totalorder %s761_s30, %s762_s1  ;;  %s767_s17 = scalar_lea.hbm %s1084_s0, 16 }
  0x25   : > { %p768_p0 = scmp.lt.s32.totalorder %s761_s30, %s1084_s0  ;;  %p769_p2 = scmp.lt.s32.totalorder %s767_s17, %s762_s1 }
  0x26   : > { %p765_p10 = pnand %p764_p9, %p763_p7 }
  0x27   : > { %p770_p6 = por %p769_p2, %p768_p0 }
  0x28   : > { %p766_p11 = pneg %p765_p10 }
  0x2a   : > { %p771_p5 = pnand %p770_p6, %p766_p11 }
  0x2c   : > { %774 = shalt.err (!%p771_p5)
}
  0x2d   : > { %617 = dma.hbm_to_vmem [thread:$0]  (!%p1001_p8), %s283_s22, 128, %s285_s28, %s273_s12  }
  0x2e   : > { %293 = sbr.rel (%p940_p3) target bundleno = 466 (0x1d2), region = 48  ;;  %s1018_s15 = sand.u32 (!%p940_p3), 1, %s856_s25  }
  0x2f   : > { %s576_s23 = sshll.u32 (!%p940_p3), %s1018_s15, 3  ;;  %s296_s18 = scalar_lea.sflag (!%p940_p3), [#allocation3], %s1018_s15 }
  0x30   : > { %s299_s1 = scalar_lea.vmem (!%p940_p3), [#allocation2], %s576_s23 }
  0x33   : > { %835 = dma.done.wait (%p983_p12), %s296_s18, 128  }
  0x34   : > { %837 = vsyncadd (%p983_p12), %s296_s18, 4294967168 }
  0x35   : > { %839 = dma.done.wait (%p46_p1), [#allocation6], 1024  }
  0x36   : > { %841 = vsyncadd (%p46_p1), [#allocation6], 4294966272 }
  0x37   : > { %843 = dma.done.wait (%p46_p1), [#allocation9], 512  }
  0x38   : > { %845 = vsyncadd (%p46_p1), [#allocation9], 4294966784  ;;  %v351_v0 = vld [vmem:[#allocation5 + $0x18] sm:$0xff]  ;;  %v350_v1 = vld [vmem:[#allocation5 + $0x10] sm:$0xff]  ;;  %vm356_vm0 = vcmask 261120   ;;  %s585_s29 = sshll.u32 %s935_s8, 3 }
  0x39   : > { %372 = vmatpush.msra.mxu0 %v351_v0  ;;  %v346_v2 = vld [vmem:[%s299_s1] sm:$0xff]  ;;  %v349_v4 = vld [vmem:[#allocation5 + $0x8] sm:$0xff]  ;;  %v348_v5 = vld [vmem:[#allocation5] sm:$0xff]  ;;  %s463_s20 = scalar_lea.hbm %s1091_s7, %s585_s29  ;;  %s345_s21 = scalar_lea.vmem [#allocation10], %s576_s23 }
  0x3a   : > { %v386_v3 = vld [vmem:[#allocation7 + $0x18] sm:$0xff]  ;;  %v347_v6 = vadd.f32 1e-08, %v346_v2  ;;  %v385_v7 = vld [vmem:[#allocation7 + $0x10] sm:$0xff]  ;;  %v384_v8 = vld [vmem:[#allocation7 + $0x8] sm:$0xff]  ;;  %s465_s18 = sshll.u32 %s345_s21, 4  ;;  %s466_s18 = int_to_ptr.vmem [resolvable:$true] %s465_s18 }
  0x3b   : > { %406 = vmatpush.msra.mxu1 %v386_v3  ;;  %373 = vmatpush.msra.mxu0 %v350_v1  ;;  %v383_v9 = vld [vmem:[#allocation7] sm:$0xff]  ;;  %v420_v10 = vld [vmem:[#allocation8 + $0x18] sm:$0xff]  ;;  %v667_v11 = vld [vmem:[%s1086_s2] ss:$0 sm:$0xff]  ;;  %s467_s1 = sshll.u32 %s463_s20, 4  ;;  %s453_s8 = scalar_lea.sflag [#allocation4], %s1018_s15  ;;  %s468_s1 = int_to_ptr.hbm [resolvable:$true] %s467_s1 }
  0x3c   : > { %440 = vmatpush.msra.mxu2 %v420_v10  ;;  %v419_v16 = vld [vmem:[#allocation8 + $0x10] sm:$0xff]  ;;  %v418_v17 = vld [vmem:[#allocation8 + $0x8] sm:$0xff]  ;;  %v417_v18 = vld [vmem:[#allocation8] sm:$0xff]  ;;  %s804_s9 = sshra.s32 %s468_s1, 4  ;;  %s810_s23 = scalar_lea.hbm %s1091_s7, 16  ;;  %s805_s9 = int_to_ptr.hbm [resolvable:$true] %s804_s9 }
  0x3d   : > { %374 = vmatpush.msra.mxu0 %v349_v4  ;;  %407 = vmatpush.msra.mxu1 %v385_v7  ;;  %v668_v19 = vld [vmem:[%s1088_s4] ss:$0 sm:$0xff]  ;;  %s806_s13 = scalar_lea.hbm %s805_s9, 8  ;;  %p811_p12 = scmp.lt.s32.totalorder %s805_s9, %s1091_s7 }
  0x3e   : > { %441 = vmatpush.msra.mxu2 %v419_v16  ;;  %v669_v24 = vld [vmem:[%s1090_s6] ss:$0 sm:$0xff]  ;;  %p807_p1 = scmp.ne.s32.totalorder %s805_s9, %s806_s13  ;;  %p812_p8 = scmp.lt.s32.totalorder %s810_s23, %s806_s13 }
  0x3f   : > { %375 = vmatpush.msra.mxu0 %v348_v5  ;;  %408 = vmatpush.msra.mxu1 %v384_v8 }
  0x40   : > { %581 = vmatmul.msk.f32.vlgmr.msra.gmra.mxu0 %vm356_vm0, %v347_v6  ;;  %442 = vmatpush.msra.mxu2 %v418_v17  ;;  %p808_p3 = pnand %p807_p1, %p987_p13  ;;  %p813_p7 = por %p812_p8, %p811_p12 }
  0x41   : > { %409 = vmatpush.msra.mxu1 %v383_v9 }
  0x42   : > { %443 = vmatpush.msra.mxu2 %v417_v18  ;;  %p809_p5 = pneg %p808_p3 }
  0x44   : > { %p814_p9 = pnand %p813_p7, %p809_p5 }
  0xbd   : > { %v377_v12 = vpop.f32.mrf.mxu0 }
  0xbe   : > { %v378_v13 = vadd.f32 %v667_v11, %v377_v12 }
  0xc0   : > { %v381_v14 = vmul.f32 0.01, %v378_v13  ;;  %vm380_vm1 = vcmp.gt.f32.partialorder %v378_v13, 0.0 }
  0xc2   : > { %v382_v15 = vsel %vm380_vm1, %v378_v13, %v381_v14 }
  0xc3   : > { %582 = vmatmul.msk.f32.vlgmr.msra.gmra.mxu1 %vm356_vm0, %v382_v15 }
 0x140   : > { %v411_v20 = vpop.f32.mrf.mxu1 }
 0x141   : > { %v412_v21 = vadd.f32 %v668_v19, %v411_v20 }
 0x143   : > { %v415_v22 = vmul.f32 0.01, %v412_v21  ;;  %vm414_vm2 = vcmp.gt.f32.partialorder %v412_v21, 0.0 }
 0x145   : > { %v416_v23 = vsel %vm414_vm2, %v412_v21, %v415_v22 }
 0x146   : > { %583 = vmatmul.msk.f32.vlgmr.msra.gmra.mxu2 %vm356_vm0, %v416_v23 }
 0x1c9   : > { %v445_v25 = vpop.f32.mrf.mxu2 }
 0x1ca   : > { %v446_v26 = vadd.f32 %v669_v24, %v445_v25 }
 0x1cc   : > { %vm448_vm3 = vcmp.gt.f32.partialorder %v446_v26, 0.0  ;;  %v449_v27 = vmul.f32 0.01, %v446_v26 }
 0x1ce   : > { %v450_v28 = vsel %vm448_vm3, %v446_v26, %v449_v27 }
 0x1cf   : > { %451 = vst.msk [vmem:[%s345_s21] sm:$0xff] %vm356_vm0, %v450_v28 }
 0x1d0   : > { %817 = shalt.err (!%p814_p9)
}
 0x1d1   : > { %602 = dma.vmem_to_hbm [thread:$0]  (%p987_p13), %s466_s18, 128, %s468_s1, %s453_s8  }
 0x1d2 PF: > { %s479_s15 = sand.u32 1, %s852_s24   ;;  %p1100_p10 = scmp.ge.s32.totalorder %s864_s27, 2 }
 0x1d3   : > { %s480_s30 = scalar_lea.sflag [#allocation4], %s479_s15 }
 0x1d4   : > { %p619_p11 = pnand %p1100_p10, %p992_p4 }
 0x1d6   : > { %p620_p0 = pneg %p619_p11 }
 0x1d8   : > { %847 = dma.done.wait (%p620_p0), %s480_s30, 128  }
 0x1d9   : > { %849 = vsyncadd (%p620_p0), %s480_s30, 4294967168  ;;  %p22_p2 = scmp.ge.s32.totalorder %s967_s10, 4   ;;  %s1101_s24 = smov %s856_s25 }
 0x1da   : > { %s1102_s25 = smov %s860_s26  ;;  %s1103_s26 = smov %s979_s11 }
 0x1db   : > { %s1104_s27 = smov %s967_s10  ;;  %24 = sbr.rel (!%p22_p2) target bundleno = 9 (0x9), region = 105 }
 0x1e0   :  { %486 = vsyncpa [#allocation3], 1 }
 0x1e1   :  { %488 = vsyncpa [#allocation3 + $0x1], 1 }
 0x1e2   :  { %489 = vsyncpa [#allocation6], 1 }
 0x1e3   :  { %490 = vsyncpa [#allocation9], 1 }
 0x1e4   :  { %491 = vsyncpa [#allocation4], 1 }
 0x1e5   :  { %493 = vsyncpa [#allocation4 + $0x1], 1 }

</bundles_post_ra>
